<compile_context>
chip_gen: v7x
topology: tpu7x:2x2x1
jax: 0.10.0
libtpu: 0.0.40
codegen_flags: <defaults>
</compile_context>

<pallas_src>
import functools

import jax
import jax.numpy as jnp
from jax.experimental import pallas as pl
from jax.experimental.pallas import tpu as pltpu


def _round_up(x, m):
    return ((x + m - 1) // m) * m


def _actor_kernel(x_ref, w_ref, b_ref, out_ref, *, sp, lw):
    # x_ref  : [tb, SP]          state tile, feature dim zero-padded to SP (mult of 8)
    # w_ref  : [SP + 2*LW, LW]   packed zero-padded W1 / W2 / W3 slab (resident)
    # b_ref  : [3, LW]           packed zero-padded b1 / b2 / b3
    # out_ref: [tb, LW]          lane-dense (128-multiple) output slab
    x = x_ref[...]
    w1 = w_ref[0:sp, :]                    # [SP, LW]
    w2 = w_ref[sp:sp + lw, :]              # [LW, LW]
    w3 = w_ref[sp + lw:sp + 2 * lw, :]     # [LW, LW]
    b1 = b_ref[0:1, :]
    b2 = b_ref[1:2, :]
    b3 = b_ref[2:3, :]

    # Zero padding keeps the extra rows/columns exactly zero through every layer,
    # so the padded math is bit-identical to the unpadded network on the real lanes.
    h1 = jnp.maximum(jnp.dot(x, w1, preferred_element_type=jnp.float32) + b1, 0.0)
    h2 = jnp.maximum(jnp.dot(h1, w2, preferred_element_type=jnp.float32) + b2, 0.0)
    out_ref[...] = jnp.tanh(jnp.dot(h2, w3, preferred_element_type=jnp.float32) + b3)


def actor_forward(state, packed, *, block_b=512):
    """state: [B, S] -> action: [B, A]."""
    B, S = state.shape
    sp, lw = packed["sp"], packed["lw"]
    A = packed["action_dim"]
    assert S == packed["state_dim"]
    w_slab, b_slab = packed["w_slab"], packed["b_slab"]
    R = w_slab.shape[0]

    # Batch tiling: single grid step for small batches; big tiles otherwise.
    if B <= block_b:
        tb = _round_up(B, 8)
        Bp = tb
    else:
        tb = _round_up(block_b, 8)
        Bp = _round_up(B, tb)

    # Pad batch rows (ragged batches) and feature lanes (S -> SP) with zeros.
    if (Bp, sp) != (B, S):
        state = jnp.pad(state, ((0, Bp - B), (0, sp - S)))

    n_steps = Bp // tb
    dim_sem = ("parallel",) if n_steps > 1 else ("arbitrary",)

    out_padded = pl.pallas_call(
        functools.partial(_actor_kernel, sp=sp, lw=lw),
        out_shape=jax.ShapeDtypeStruct((Bp, lw), jnp.float32),
        grid=(n_steps,),
        in_specs=[
            pl.BlockSpec((tb, sp), lambda i: (i, 0)),   # state tile streams over grid
            pl.BlockSpec((R, lw), lambda i: (0, 0)),    # packed weights: resident
            pl.BlockSpec((3, lw), lambda i: (0, 0)),    # packed biases:  resident
        ],
        out_specs=pl.BlockSpec((tb, lw), lambda i: (i, 0)),
        compiler_params=pltpu.CompilerParams(dimension_semantics=dim_sem),
    )(state, w_slab, b_slab)

    return out_padded[:B, :A]


# ------------------------- parameter init & packing -------------------------

def _xavier_uniform_t(key, fan_in, fan_out):
    # torch.nn.init.xavier_uniform_ (gain=1) on a PyTorch (out,in) weight,
    # transposed once to (in, out) so the forward pass never transposes.
    limit = jnp.sqrt(6.0 / (fan_in + fan_out))
    w_torch = jax.random.uniform(key, (fan_out, fan_in), jnp.float32, -limit, limit)
    return w_torch.T


def _linear_bias(key, fan_in, size):
    # PyTorch nn.Linear default bias init: U(-1/sqrt(fan_in), 1/sqrt(fan_in)).
    bound = 1.0 / jnp.sqrt(jnp.float32(fan_in))
    return jax.random.uniform(key, (1, size), jnp.float32, -bound, bound)


def init_actor_params(key, input_size, hidden_size, output_size):
    k1, k2, k3, kb1, kb2, kb3 = jax.random.split(key, 6)
    return {
        "w1": _xavier_uniform_t(k1, input_size, hidden_size),    # [S, H]
        "b1": _linear_bias(kb1, input_size, hidden_size),        # [1, H]
        "w2": _xavier_uniform_t(k2, hidden_size, hidden_size),   # [H, H]
        "b2": _linear_bias(kb2, hidden_size, hidden_size),       # [1, H]
        "w3": _xavier_uniform_t(k3, hidden_size, output_size),   # [H, A]
        "b3": _linear_bias(kb3, hidden_size, output_size),       # [1, A]
    }


def pack_actor_params(params):
    """One-time packing of the 6 layer params into 2 zero-padded VMEM-friendly slabs."""
    w1, w2, w3 = params["w1"], params["w2"], params["w3"]
    S, H = w1.shape
    A = w3.shape[1]
    sp = _round_up(S, 8)                   # sublane-aligned input width
    lw = _round_up(max(H, A), 128)         # lane-dense hidden/output width

    w_slab = jnp.zeros((sp + 2 * lw, lw), jnp.float32)
    w_slab = w_slab.at[0:S, 0:H].set(w1)                       # W1 block
    w_slab = w_slab.at[sp:sp + H, 0:H].set(w2)                 # W2 block
    w_slab = w_slab.at[sp + lw:sp + lw + H, 0:A].set(w3)       # W3 block

    b_slab = jnp.zeros((3, lw), jnp.float32)
    b_slab = b_slab.at[0, 0:H].set(params["b1"][0])
    b_slab = b_slab.at[1, 0:H].set(params["b2"][0])
    b_slab = b_slab.at[2, 0:A].set(params["b3"][0])

    return {
        "w_slab": w_slab,
        "b_slab": b_slab,
        "sp": sp,
        "lw": lw,
        "state_dim": S,
        "hidden_dim": H,
        "action_dim": A,
    }


if __name__ == "__main__":
    # fiveD stabilizer Actor: 5-D state -> hidden 32 -> hidden 32 -> 5-D action
    batch = 16
    state_dim = 5
    hidden = 32
    action_dim = 5

    key = jax.random.PRNGKey(0)
    kp, ks, ks2 = jax.random.split(key, 3)
    params = init_actor_params(kp, state_dim, hidden, action_dim)
    packed = pack_actor_params(params)     # packed once; reused across all calls

    def reference(x):
        h1 = jax.nn.relu(x @ params["w1"] + params["b1"])
        h2 = jax.nn.relu(h1 @ params["w2"] + params["b2"])
        return jnp.tanh(h2 @ params["w3"] + params["b3"])

    # 1) Small inference-style batch: single grid step, no batch tiling.
    state = jax.random.normal(ks, (batch, state_dim), jnp.float32)
    action = jax.block_until_ready(actor_forward(state, packed))
    assert action.shape == (batch, action_dim)
    assert jnp.allclose(action, reference(state), atol=2e-5, rtol=2e-5)

    # 2) Larger ragged batch: exercises batch tiling, padding, and the
    #    multi-step "parallel" grid path.
    big_state = jax.random.normal(ks2, (300, state_dim), jnp.float32)
    big_action = jax.block_until_ready(actor_forward(big_state, packed, block_b=128))
    assert big_action.shape == (300, action_dim)
    assert jnp.allclose(big_action, reference(big_state), atol=2e-5, rtol=2e-5)

    # TODO(synk): OUNoise / select_action(noiseFlag=True) is a stateful host-side
    # exploration policy, not part of forward(); intentionally not in the kernel.
    print("KERNEL_OK")
</pallas_src>

<mosaic_0001>
module attributes {stable_mosaic.version = 11 : i64} {
  func.func @_actor_kernel(%arg0: i32, %arg1: memref<16x8xf32, #tpu.memory_space<vmem>>, %arg2: memref<264x128xf32, #tpu.memory_space<vmem>>, %arg3: memref<3x128xf32, #tpu.memory_space<vmem>>, %arg4: memref<16x128xf32, #tpu.memory_space<vmem>>) attributes {dimension_semantics = [#tpu.dimension_semantics<arbitrary>], iteration_bounds = array<i64: 1>, scalar_prefetch = 0 : i64, scratch_operands = 0 : i64, tpu.core_type = #tpu.core_type<tc>, window_params = [{transform_indices = @transform_0, window_bounds = array<i64: 16, 8>}, {pipeline_mode = #tpu.pipeline_mode<synchronous>, transform_indices = @transform_1, window_bounds = array<i64: 264, 128>}, {pipeline_mode = #tpu.pipeline_mode<synchronous>, transform_indices = @transform_2, window_bounds = array<i64: 3, 128>}, {transform_indices = @transform_3, window_bounds = array<i64: 16, 128>}]} {
    %c0 = arith.constant 0 : index
    %c0_0 = arith.constant 0 : index
    %0 = vector.load %arg1[%c0, %c0_0] : memref<16x8xf32, #tpu.memory_space<vmem>>, vector<16x8xf32>
    %c0_1 = arith.constant 0 : index
    %c0_2 = arith.constant 0 : index
    %1 = vector.load %arg2[%c0_1, %c0_2] : memref<264x128xf32, #tpu.memory_space<vmem>>, vector<8x128xf32>
    %c8 = arith.constant 8 : index
    %c0_3 = arith.constant 0 : index
    %2 = vector.load %arg2[%c8, %c0_3] : memref<264x128xf32, #tpu.memory_space<vmem>>, vector<128x128xf32>
    %c136 = arith.constant 136 : index
    %c0_4 = arith.constant 0 : index
    %3 = vector.load %arg2[%c136, %c0_4] : memref<264x128xf32, #tpu.memory_space<vmem>>, vector<128x128xf32>
    %c0_5 = arith.constant 0 : index
    %c0_6 = arith.constant 0 : index
    %4 = vector.load %arg3[%c0_5, %c0_6] : memref<3x128xf32, #tpu.memory_space<vmem>>, vector<1x128xf32>
    %c1 = arith.constant 1 : index
    %c0_7 = arith.constant 0 : index
    %5 = vector.load %arg3[%c1, %c0_7] : memref<3x128xf32, #tpu.memory_space<vmem>>, vector<1x128xf32>
    %c2 = arith.constant 2 : index
    %c0_8 = arith.constant 0 : index
    %6 = vector.load %arg3[%c2, %c0_8] : memref<3x128xf32, #tpu.memory_space<vmem>>, vector<1x128xf32>
    %cst = arith.constant dense<0.000000e+00> : vector<16x128xf32>
    %7 = tpu.matmul %0, %1, %cst {dimension_numbers = #tpu.dot_dimension_numbers<[1], [0], [0], [1], [0, 0, 1, 1], [], []>} : vector<16x8xf32>, vector<8x128xf32>, vector<16x128xf32> -> vector<16x128xf32>
    %8 = vector.broadcast %4 : vector<1x128xf32> to vector<16x128xf32>
    %9 = arith.addf %7, %8 : vector<16x128xf32>
    %cst_9 = arith.constant 0.000000e+00 : f32
    %10 = vector.broadcast %cst_9 : f32 to vector<16x128xf32>
    %11 = arith.maximumf %9, %10 : vector<16x128xf32>
    %cst_10 = arith.constant dense<0.000000e+00> : vector<16x128xf32>
    %12 = tpu.matmul %11, %2, %cst_10 {dimension_numbers = #tpu.dot_dimension_numbers<[1], [0], [0], [1], [0, 0, 1, 1], [], []>} : vector<16x128xf32>, vector<128x128xf32>, vector<16x128xf32> -> vector<16x128xf32>
    %13 = vector.broadcast %5 : vector<1x128xf32> to vector<16x128xf32>
    %14 = arith.addf %12, %13 : vector<16x128xf32>
    %cst_11 = arith.constant 0.000000e+00 : f32
    %15 = vector.broadcast %cst_11 : f32 to vector<16x128xf32>
    %16 = arith.maximumf %14, %15 : vector<16x128xf32>
    %cst_12 = arith.constant dense<0.000000e+00> : vector<16x128xf32>
    %17 = tpu.matmul %16, %3, %cst_12 {dimension_numbers = #tpu.dot_dimension_numbers<[1], [0], [0], [1], [0, 0, 1, 1], [], []>} : vector<16x128xf32>, vector<128x128xf32>, vector<16x128xf32> -> vector<16x128xf32>
    %18 = vector.broadcast %6 : vector<1x128xf32> to vector<16x128xf32>
    %19 = arith.addf %17, %18 : vector<16x128xf32>
    %20 = math.tanh %19 : vector<16x128xf32>
    %c0_13 = arith.constant 0 : index
    %c0_14 = arith.constant 0 : index
    %21 = vector.load %arg4[%c0_13, %c0_14] : memref<16x128xf32, #tpu.memory_space<vmem>>, vector<16x128xf32>
    tpu.vector_store %arg4[%c0_13, %c0_14], %20 {strides = array<i32>} : memref<16x128xf32, #tpu.memory_space<vmem>>, vector<16x128xf32>,
    return
  }
  func.func @transform_0(%arg0: i32) -> (i32, i32) {
    %c0_i32 = arith.constant 0 : i32
    %c0_i32_0 = arith.constant 0 : i32
    return %arg0, %c0_i32 : i32, i32
  }
  func.func @transform_1(%arg0: i32) -> (i32, i32) {
    %c0_i32 = arith.constant 0 : i32
    %c0_i32_0 = arith.constant 0 : i32
    %c0_i32_1 = arith.constant 0 : i32
    return %c0_i32, %c0_i32_0 : i32, i32
  }
  func.func @transform_2(%arg0: i32) -> (i32, i32) {
    %c0_i32 = arith.constant 0 : i32
    %c0_i32_0 = arith.constant 0 : i32
    %c0_i32_1 = arith.constant 0 : i32
    return %c0_i32, %c0_i32_0 : i32, i32
  }
  func.func @transform_3(%arg0: i32) -> (i32, i32) {
    %c0_i32 = arith.constant 0 : i32
    %c0_i32_0 = arith.constant 0 : i32
    return %arg0, %c0_i32 : i32, i32
  }
}

</mosaic_0001>

<bundles_post_ra>
// kernel: tpu_custom_call.1
= control target key start
LH: loop header
LB: loop body
LE: loop exit
PB: predicated region body
PF: predicated region fallthrough
CT: control target
= control target key end

     0   :  { %8 = vsyncpa [#allocation3], 0  ;;  %s644_s0 = inlined_call_operand.vmem [shape: f32[16,8], index: 0, kind: input, shape index: {}]   ;;  %s645_s1 = inlined_call_operand.hbm [shape: f32[264,128], index: 1, kind: input, shape index: {}]   ;;  %s646_s2 = inlined_call_operand.vmem [shape: f32[3,128], index: 2, kind: input, shape index: {}]   ;;  %s647_s3 = inlined_call_operand.hbm [shape: f32[16,128], index: 3, kind: output, shape index: {}]  }
   0x1   :  { %9 = vsyncpa [#allocation4], 0  ;;  %s575_s12 = smov [#allocation2]   ;;  %s527_s16 = scalar_lea.hbm %s645_s1, 4224 }
   0x2   :  { %s17_s13 = sshll.u32 %s575_s12, 4  ;;  %p528_p0 = scmp.ne.s32.totalorder %s645_s1, %s527_s16  ;;  %s18_s13 = int_to_ptr.vmem [resolvable:$true] %s17_s13 }
   0x3   :  { %p531_p1 = scmp.lt.u32.totalorder %s527_s16, %s645_s1 }
   0x5   :  { %p533_p2 = pnand %p531_p1, %p528_p0 }
   0x7   :  { %536 = shalt.err (!%p533_p2)
}
   0x8   :  { %s537_s21 = scalar_lea.vmem %s18_s13, 4224  ;;  %p542_p4 = scmp.lt.s32.totalorder %s18_s13, %s18_s13 }
   0x9   :  { %p538_p3 = scmp.ne.s32.totalorder %s18_s13, %s537_s21  ;;  %p543_p5 = scmp.lt.s32.totalorder %s537_s21, %s537_s21 }
   0xb   :  { %p544_p6 = por %p543_p5, %p542_p4 }
   0xd   :  { %p545_p7 = pnand %p544_p6, %p538_p3 }
   0xf   :  { %548 = shalt.err (!%p545_p7)
}
  0x10   :  { %s576_s22 = smov 128   ;;  %s577_s23 = smov 8  }
  0x11   :  { %23 = dma.hbm_to_vmem [thread:$0]  %s645_s1, 4224, %s18_s13, [#allocation3], %s576_s22, %s576_s22, %s577_s23  }
  0x12   :  { %571 = dma.done.wait [#allocation3], 4224  }
  0x13   :  { %572 = vsyncadd [#allocation3], 4294963072  ;;  %vm71_vm0 = vcmask 64512   ;;  %v31_v0 = vld [vmem:[#allocation2] sm:$0xff]  ;;  %v29_v1 = vld [vmem:[%s644_s0] sm:$0xff]  ;;  %s578_s7 = smov [#allocation5]  }
  0x14   :  { %v30_v2 = vld [vmem:[%s644_s0 + $0x8] sm:$0xff]  ;;  %380 = vmatprep.subr.mxu0 %v31_v0  ;;  %382 = vmatprep.mubr.msk.f32.mxu0 %vm71_vm0, %v29_v1  ;;  %v32_v3 = vld [vmem:[#allocation2 + $0x8] sm:$0xff]  ;;  %v33_v4 = vld [vmem:[#allocation2 + $0x10] sm:$0xff]  ;;  %s324_s8 = sshll.u32 %s578_s7, 4  ;;  %s325_s8 = int_to_ptr.vmem [resolvable:$true] %s324_s8 }
  0x15   :  { %v34_v5 = vld [vmem:[#allocation2 + $0x18] sm:$0xff]  ;;  %381 = vmatpush3.msra.mxu0 %v31_v0  ;;  %v455_v6 = vpack.c.bf16 %v33_v4, %v32_v3  ;;  %v35_v7 = vld [vmem:[#allocation2 + $0x20] sm:$0xff]  ;;  %v36_v9 = vld [vmem:[#allocation2 + $0x28] sm:$0xff]  ;;  %s549_s9 = scalar_lea.vmem %s325_s8, 256  ;;  %p554_p9 = scmp.lt.s32.totalorder %s325_s8, %s325_s8 }
  0x16   :  { %383 = vmatmul.mubr.msk.f32.vlgmr.msra.gmra.mrb[0].mxu0 %vm71_vm0, %v30_v2  ;;  %v459_v8 = vpack.c.bf16 %v35_v7, %v34_v5  ;;  %v37_v10 = vld [vmem:[#allocation2 + $0x30] sm:$0xff]  ;;  %v38_v12 = vld [vmem:[#allocation2 + $0x38] sm:$0xff]  ;;  %v39_v13 = vld [vmem:[#allocation2 + $0x40] sm:$0xff]  ;;  %p550_p8 = scmp.ne.s32.totalorder %s325_s8, %s549_s9  ;;  %p555_p10 = scmp.lt.s32.totalorder %s549_s9, %s549_s9 }
  0x17   :  { %456 = vmatprep.subr.bf16.mxu1 %v455_v6  ;;  %v463_v11 = vpack.c.bf16 %v37_v10, %v36_v9  ;;  %v467_v14 = vpack.c.bf16 %v39_v13, %v38_v12  ;;  %v40_v15 = vld [vmem:[#allocation2 + $0x48] sm:$0xff]  ;;  %v41_v16 = vld [vmem:[#allocation2 + $0x50] sm:$0xff]  ;;  %v42_v18 = vld [vmem:[#allocation2 + $0x58] sm:$0xff] }
  0x18   :  { %458 = vmatpush3.bf16.msra.mxu1 %v455_v6  ;;  %v471_v17 = vpack.c.bf16 %v41_v16, %v40_v15  ;;  %v43_v19 = vld [vmem:[#allocation2 + $0x60] sm:$0xff]  ;;  %v44_v21 = vld [vmem:[#allocation2 + $0x68] sm:$0xff]  ;;  %v45_v22 = vld [vmem:[#allocation2 + $0x70] sm:$0xff]  ;;  %p556_p11 = por %p555_p10, %p554_p9 }
  0x19   :  { %460 = vmatprep.subr.bf16.mxu1 %v459_v8  ;;  %v475_v20 = vpack.c.bf16 %v43_v19, %v42_v18  ;;  %v479_v23 = vpack.c.bf16 %v45_v22, %v44_v21  ;;  %v46_v24 = vld [vmem:[#allocation2 + $0x78] sm:$0xff]  ;;  %v47_v25 = vld [vmem:[#allocation2 + $0x80] sm:$0xff]  ;;  %v48_v27 = vld [vmem:[#allocation2 + $0x88] sm:$0xff] }
  0x1a   :  { %v483_v26 = vpack.c.bf16 %v47_v25, %v46_v24  ;;  %v49_v28 = vld [vmem:[#allocation2 + $0x90] sm:$0xff]  ;;  %v50_v29 = vld [vmem:[#allocation2 + $0x98] sm:$0xff]  ;;  %v51_v31 = vld [vmem:[#allocation2 + $0xa0] sm:$0xff]  ;;  %p557_p12 = pnand %p556_p11, %p550_p8 }
  0x1b   :  { %v487_v30 = vpack.c.bf16 %v49_v28, %v48_v27  ;;  %v491_v32 = vpack.c.bf16 %v51_v31, %v50_v29  ;;  %v52_v33 = vld [vmem:[#allocation2 + $0xa8] sm:$0xff]  ;;  %v53_v34 = vld [vmem:[#allocation2 + $0xb0] sm:$0xff]  ;;  %v54_v36 = vld [vmem:[#allocation2 + $0xb8] sm:$0xff] }
  0x1c   :  { %462 = vmatpush3.bf16.msra.mxu1 %v459_v8  ;;  %v495_v35 = vpack.c.bf16 %v53_v34, %v52_v33  ;;  %v55_v37 = vld [vmem:[#allocation2 + $0xc0] sm:$0xff]  ;;  %v56_v39 = vld [vmem:[#allocation2 + $0xc8] sm:$0xff]  ;;  %v57_v40 = vld [vmem:[#allocation2 + $0xd0] sm:$0xff] }
  0x1d   :  { %464 = vmatprep.subr.bf16.mxu1 %v463_v11  ;;  %488 = vmatprep.subr.bf16.mxu0 %v487_v30  ;;  %v499_v38 = vpack.c.bf16 %v55_v37, %v54_v36  ;;  %v503_v41 = vpack.c.bf16 %v57_v40, %v56_v39  ;;  %v58_v42 = vld [vmem:[#allocation2 + $0xd8] sm:$0xff]  ;;  %v59_v43 = vld [vmem:[#allocation2 + $0xe0] sm:$0xff]  ;;  %v60_v45 = vld [vmem:[#allocation2 + $0xe8] sm:$0xff] }
  0x1e   :  { %490 = vmatpush3.bf16.msra.mxu0 %v487_v30  ;;  %v507_v44 = vpack.c.bf16 %v59_v43, %v58_v42  ;;  %v61_v46 = vld [vmem:[#allocation2 + $0xf0] sm:$0xff]  ;;  %v62_v55 = vld [vmem:[#allocation2 + $0xf8] sm:$0xff]  ;;  %v63_v56 = vld [vmem:[#allocation2 + $0x100] sm:$0xff] }
  0x1f   :  { %492 = vmatprep.subr.bf16.mxu0 %v491_v32  ;;  %v511_v47 = vpack.c.bf16 %v61_v46, %v60_v45  ;;  %v336_v48 = vld [vmem:[%s646_s2] ss:$0 sm:$0xff]  ;;  %v515_v57 = vpack.c.bf16 %v63_v56, %v62_v55  ;;  %v339_v58 = vld [vmem:[%s646_s2 + $0x1] ss:$0 sm:$0xff]  ;;  %v340_v1 = vld [vmem:[%s646_s2 + $0x2] ss:$0 sm:$0xff] }
  0x20   :  { %466 = vmatpush3.bf16.msra.mxu1 %v463_v11 }
  0x21   :  { %468 = vmatprep.subr.bf16.mxu1 %v467_v14 }
  0x22   :  { %494 = vmatpush3.bf16.msra.mxu0 %v491_v32 }
  0x23   :  { %496 = vmatprep.subr.bf16.mxu0 %v495_v35 }
  0x24   :  { %470 = vmatpush3.bf16.msra.mxu1 %v467_v14 }
  0x25   :  { %472 = vmatprep.subr.bf16.mxu1 %v471_v17 }
  0x26   :  { %498 = vmatpush3.bf16.msra.mxu0 %v495_v35 }
  0x27   :  { %500 = vmatprep.subr.bf16.mxu0 %v499_v38 }
  0x28   :  { %474 = vmatpush3.bf16.msra.mxu1 %v471_v17 }
  0x29   :  { %476 = vmatprep.subr.bf16.mxu1 %v475_v20 }
  0x2a   :  { %502 = vmatpush3.bf16.msra.mxu0 %v499_v38 }
  0x2b   :  { %504 = vmatprep.subr.bf16.mxu0 %v503_v41 }
  0x2c   :  { %478 = vmatpush3.bf16.msra.mxu1 %v475_v20 }
  0x2d   :  { %480 = vmatprep.subr.bf16.mxu1 %v479_v23 }
  0x2e   :  { %506 = vmatpush3.bf16.msra.mxu0 %v503_v41 }
  0x2f   :  { %508 = vmatprep.subr.bf16.mxu0 %v507_v44 }
  0x30   :  { %482 = vmatpush3.bf16.msra.mxu1 %v479_v23 }
  0x31   :  { %484 = vmatprep.subr.bf16.mxu1 %v483_v26 }
  0x32   :  { %510 = vmatpush3.bf16.msra.mxu0 %v507_v44 }
  0x33   :  { %512 = vmatprep.subr.bf16.mxu0 %v511_v47 }
  0x34   :  { %486 = vmatpush3.bf16.msra.mxu1 %v483_v26 }
  0x36   :  { %514 = vmatpush3.bf16.msra.mxu0 %v511_v47 }
  0x37   :  { %516 = vmatprep.subr.bf16.mxu0 %v515_v57 }
  0x3a   :  { %518 = vmatpush3.bf16.msra.mxu0 %v515_v57 }
  0xe9   :  { %v384_v49 = vpop.f32.mrb[0].mxu0 }
  0xea   :  { %v150_v50 = vadd.f32 %v384_v49, %v336_v48  ;;  %v144_v51 = vpop.f32.mrb[1].mxu0 }
  0xeb   :  { %v145_v52 = vadd.f32 %v336_v48, %v144_v51 }
  0xec   :  { %v154_v54 = vmax.f32 %v150_v50, 0.0 }
  0xed   :  { %v153_v53 = vmax.f32 %v145_v52, 0.0 }
  0xef   :  { %417 = vmatprep.mubr.f32.mxu1 %v153_v53 }
  0xf0   :  { %418 = vmatmul.mubr.f32.vlgmr.msra.gmra.mrb[0].mxu1 %v154_v54 }
 0x1c3   :  { %v419_v59 = vpop.f32.mrb[0].mxu1 }
 0x1c4   :  { %v231_v60 = vadd.f32 %v419_v59, %v339_v58  ;;  %v225_v61 = vpop.f32.mrb[1].mxu1 }
 0x1c5   :  { %v226_v62 = vadd.f32 %v339_v58, %v225_v61 }
 0x1c6   :  { %v235_v0 = vmax.f32 %v231_v60, 0.0 }
 0x1c7   :  { %v234_v63 = vmax.f32 %v226_v62, 0.0 }
 0x1c9   :  { %452 = vmatprep.mubr.f32.mxu0 %v234_v63 }
 0x1ca   :  { %453 = vmatmul.mubr.f32.vlgmr.msra.gmra.mrb[2].mxu0 %v235_v0 }
 0x29d   :  { %v454_v2 = vpop.f32.mrb[2].mxu0 }
 0x29e   :  { %v312_v3 = vadd.f32 %v454_v2, %v340_v1  ;;  %v306_v4 = vpop.f32.mrb[3].mxu0 }
 0x29f   :  { %v307_v5 = vadd.f32 %v340_v1, %v306_v4 }
 0x2a0   :  { %523 = vtanh.f32 %v312_v3 }
 0x2a1   :  { %525 = vtanh.f32 %v307_v5 }
 0x2aa   :  { %v524_v6 = vpop.eup %523 }
 0x2ab   :  { %v526_v7 = vpop.eup %525  ;;  %318 = vst [vmem:[#allocation5 + $0x8] sm:$0xff] %v524_v6 }
 0x2ac   :  { %317 = vst [vmem:[#allocation5] sm:$0xff] %v526_v7 }
 0x2ad   :  { %560 = shalt.err (!%p557_p12)
}
 0x2ae   :  { %s561_s11 = scalar_lea.hbm %s647_s3, 256 }
 0x2af   :  { %p562_p13 = scmp.ne.s32.totalorder %s647_s3, %s561_s11  ;;  %p565_p0 = scmp.lt.u32.totalorder %s561_s11, %s647_s3 }
 0x2b1   :  { %p567_p1 = pnand %p565_p0, %p562_p13 }
 0x2b3   :  { %570 = shalt.err (!%p567_p1)
}
 0x2b4   :  { %330 = dma.vmem_to_hbm [thread:$0]  %s325_s8, 256, %s647_s3, [#allocation4], %s576_s22, %s576_s22, %s577_s23  }
 0x2b5   :  { %573 = dma.done.wait [#allocation4], 256  }
 0x2b6   :  { %574 = vsyncadd [#allocation4], 4294967040 }
 0x2b7   :  { %334 = vsyncpa [#allocation3], 1 }
 0x2b8   :  { %335 = vsyncpa [#allocation4], 1 }

</bundles_post_ra>
